<compile_context>
chip_gen: v5e
topology: v5e:2x2
jax: 0.10.0
libtpu: 0.0.40
codegen_flags: <defaults>
</compile_context>

<pallas_src>
import jax
import jax.numpy as jnp
from jax.experimental import pallas as pl
from jax.experimental.pallas import tpu as pltpu

NUM_ITERS = 10

LANE_COLS = 1024          # lane width: multiple of 128 -> lane-dense, unmasked stores
MAX_ROW_TILE = 512        # 512 * 1024 * 4B = 2 MiB per array per grid step


def _round_up(x: int, m: int) -> int:
    return (x + m - 1) // m * m


def toy_mem_planning_kernel(a_ref, b_ref, o_ref):
    """Elementwise fused kernel: o = ((a*a + b)*a + b)... 10 times."""
    a = a_ref[...]
    b = b_ref[...]
    o = a
    # Short fixed trip-count; unrolled Python loop keeps everything in vregs.
    for _ in range(NUM_ITERS):
        o = o * a
        o = o + b
    o_ref[...] = o


def toy_model_forward(a: jax.Array, b: jax.Array) -> jax.Array:
    """JAX wrapper reproducing ToyModelForMemPlanning.forward(a, b).

    Assumes a and b have identical shapes (as in get_random_inputs()).
    """
    orig_shape = a.shape
    dtype = a.dtype
    n = a.size

    # ---- lane-dense 2-D slab layout: (rows_padded, LANE_COLS) -------------
    rows = pl.cdiv(n, LANE_COLS)
    row_tile = min(MAX_ROW_TILE, _round_up(rows, 8))   # multiple of 8 sublanes
    rows_padded = _round_up(rows, row_tile)
    padded_len = rows_padded * LANE_COLS

    a_flat = a.reshape(-1)
    b_flat = b.reshape(-1)
    pad = padded_len - n
    a2 = jnp.pad(a_flat, (0, pad)).reshape(rows_padded, LANE_COLS)
    b2 = jnp.pad(b_flat, (0, pad)).reshape(rows_padded, LANE_COLS)

    grid = (rows_padded // row_tile,)
    block = (row_tile, LANE_COLS)

    out = pl.pallas_call(
        toy_mem_planning_kernel,
        out_shape=jax.ShapeDtypeStruct((rows_padded, LANE_COLS), dtype),
        grid=grid,
        in_specs=[
            pl.BlockSpec(block, lambda i: (i, 0)),
            pl.BlockSpec(block, lambda i: (i, 0)),
        ],
        out_specs=pl.BlockSpec(block, lambda i: (i, 0)),
        input_output_aliases={0: 0},   # output reuses a2's HBM buffer
        compiler_params=pltpu.CompilerParams(
            dimension_semantics=("parallel",),
        ),
    )(a2, b2)

    # Strip padding and restore the original shape.
    return out.reshape(-1)[:n].reshape(orig_shape)


def toy_model_forward_ref(a: jax.Array, b: jax.Array) -> jax.Array:
    """Pure-JAX reference (mirrors the PyTorch loop)."""
    o = a
    for _ in range(NUM_ITERS):
        o = o * a
        o = o + b
    return o


if __name__ == "__main__":
    key = jax.random.PRNGKey(0)
    ka, kb = jax.random.split(key)
    # Same shapes as ToyModelForMemPlanning.get_random_inputs(): two (10,) f32.
    a = jax.random.normal(ka, (10,), dtype=jnp.float32)
    b = jax.random.normal(kb, (10,), dtype=jnp.float32)

    out = toy_model_forward(a, b)
    out = jax.block_until_ready(out)

    ref = toy_model_forward_ref(a, b)
    assert out.shape == (10,) and out.dtype == jnp.float32
    assert jnp.allclose(out, ref, rtol=1e-6, atol=1e-6), "mismatch vs reference"

    print("KERNEL_OK")
</pallas_src>

<mosaic_0001>
module attributes {stable_mosaic.version = 11 : i64} {
  func.func @toy_mem_planning_kernel(%arg0: i32, %arg1: memref<8x1024xf32, #tpu.memory_space<vmem>>, %arg2: memref<8x1024xf32, #tpu.memory_space<vmem>>, %arg3: memref<8x1024xf32, #tpu.memory_space<vmem>>) attributes {dimension_semantics = [#tpu.dimension_semantics<parallel>], iteration_bounds = array<i64: 1>, scalar_prefetch = 0 : i64, scratch_operands = 0 : i64, tpu.core_type = #tpu.core_type<tc>, window_params = [{transform_indices = @transform_0, window_bounds = array<i64: 8, 1024>}, {transform_indices = @transform_1, window_bounds = array<i64: 8, 1024>}, {transform_indices = @transform_2, window_bounds = array<i64: 8, 1024>}]} {
    %c0 = arith.constant 0 : index
    %c0_0 = arith.constant 0 : index
    %0 = vector.load %arg1[%c0, %c0_0] : memref<8x1024xf32, #tpu.memory_space<vmem>>, vector<8x1024xf32>
    %c0_1 = arith.constant 0 : index
    %c0_2 = arith.constant 0 : index
    %1 = vector.load %arg2[%c0_1, %c0_2] : memref<8x1024xf32, #tpu.memory_space<vmem>>, vector<8x1024xf32>
    %2 = arith.mulf %0, %0 : vector<8x1024xf32>
    %3 = arith.addf %2, %1 : vector<8x1024xf32>
    %4 = arith.mulf %3, %0 : vector<8x1024xf32>
    %5 = arith.addf %4, %1 : vector<8x1024xf32>
    %6 = arith.mulf %5, %0 : vector<8x1024xf32>
    %7 = arith.addf %6, %1 : vector<8x1024xf32>
    %8 = arith.mulf %7, %0 : vector<8x1024xf32>
    %9 = arith.addf %8, %1 : vector<8x1024xf32>
    %10 = arith.mulf %9, %0 : vector<8x1024xf32>
    %11 = arith.addf %10, %1 : vector<8x1024xf32>
    %12 = arith.mulf %11, %0 : vector<8x1024xf32>
    %13 = arith.addf %12, %1 : vector<8x1024xf32>
    %14 = arith.mulf %13, %0 : vector<8x1024xf32>
    %15 = arith.addf %14, %1 : vector<8x1024xf32>
    %16 = arith.mulf %15, %0 : vector<8x1024xf32>
    %17 = arith.addf %16, %1 : vector<8x1024xf32>
    %18 = arith.mulf %17, %0 : vector<8x1024xf32>
    %19 = arith.addf %18, %1 : vector<8x1024xf32>
    %20 = arith.mulf %19, %0 : vector<8x1024xf32>
    %21 = arith.addf %20, %1 : vector<8x1024xf32>
    %c0_3 = arith.constant 0 : index
    %c0_4 = arith.constant 0 : index
    %22 = vector.load %arg3[%c0_3, %c0_4] : memref<8x1024xf32, #tpu.memory_space<vmem>>, vector<8x1024xf32>
    tpu.vector_store %arg3[%c0_3, %c0_4], %21 {strides = array<i32>} : memref<8x1024xf32, #tpu.memory_space<vmem>>, vector<8x1024xf32>,
    return
  }
  func.func @transform_0(%arg0: i32) -> (i32, i32) {
    %c0_i32 = arith.constant 0 : i32
    %c0_i32_0 = arith.constant 0 : i32
    return %arg0, %c0_i32 : i32, i32
  }
  func.func @transform_1(%arg0: i32) -> (i32, i32) {
    %c0_i32 = arith.constant 0 : i32
    %c0_i32_0 = arith.constant 0 : i32
    return %arg0, %c0_i32 : i32, i32
  }
  func.func @transform_2(%arg0: i32) -> (i32, i32) {
    %c0_i32 = arith.constant 0 : i32
    %c0_i32_0 = arith.constant 0 : i32
    return %arg0, %c0_i32 : i32, i32
  }
}

</mosaic_0001>

<bundles_post_ra>
// kernel: tpu_custom_call.1
= control target key start
LH: loop header
LB: loop body
LE: loop exit
PB: predicated region body
PF: predicated region fallthrough
CT: control target
= control target key end

     0   :  { %7 = vsyncpa [#allocation3], 0  ;;  %s528_s0 = inlined_call_operand.hbm [shape: f32[8,1024], index: 0, kind: input, shape index: {}, may-alias: {0,2}]   ;;  %s529_s1 = inlined_call_operand.vmem [shape: f32[8,1024], index: 1, kind: input, shape index: {}]   ;;  %s530_s2 = inlined_call_operand.hbm [shape: f32[8,1024], index: 2, kind: output, shape index: {}, may-alias: {0,2}]  }
   0x1   :  { %8 = vsyncpa [#allocation4], 0  ;;  %s14_s11 = sshll.u32 %s528_s0, 4  ;;  %s281_s12 = smov [#allocation2]   ;;  %s15_s11 = int_to_ptr.hbm [resolvable:$true] %s14_s11 }
   0x2   :  { %s16_s13 = sshll.u32 %s281_s12, 4  ;;  %s17_s13 = int_to_ptr.vmem [resolvable:$true] %s16_s13 }
   0x3   :  { %19 = dma.hbm_to_vmem [thread:$0]  %s15_s11, 1024, %s17_s13, [#allocation3]  }
   0x4   :  { %277 = dma.done.wait [#allocation3], 1024  }
   0x5   :  { %278 = vsyncadd [#allocation3], 4294966272  ;;  %v301_v0 = vld [vmem:[#allocation2] sm:$0xff]  ;;  %v308_v2 = vld [vmem:[#allocation2 + $0x8] sm:$0xff]  ;;  %s217_s4 = sshll.u32 %s530_s2, 4  ;;  %s218_s4 = int_to_ptr.hbm [resolvable:$true] %s217_s4 }
   0x6   :  { %v306_v1 = vld [vmem:[%s529_s1] sm:$0xff]  ;;  %v42_v3 = vmul.f32 %v301_v0, %v301_v0  ;;  %v315_v4 = vld [vmem:[%s529_s1 + $0x8] sm:$0xff]  ;;  %v43_v5 = vmul.f32 %v308_v2, %v308_v2  ;;  %v319_v6 = vld [vmem:[#allocation2 + $0x10] sm:$0xff] }
   0x7   :  { %v324_v7 = vld [vmem:[%s529_s1 + $0x10] sm:$0xff]  ;;  %v44_v8 = vmul.f32 %v319_v6, %v319_v6  ;;  %v328_v9 = vld [vmem:[#allocation2 + $0x18] sm:$0xff]  ;;  %v335_v11 = vld [vmem:[#allocation2 + $0x20] sm:$0xff] }
   0x8   :  { %v333_v10 = vld [vmem:[%s529_s1 + $0x18] sm:$0xff]  ;;  %v50_v12 = vadd.f32 %v42_v3, %v306_v1  ;;  %v51_v13 = vadd.f32 %v43_v5, %v315_v4  ;;  %v45_v14 = vmul.f32 %v328_v9, %v328_v9  ;;  %v344_v15 = vld [vmem:[%s529_s1 + $0x20] sm:$0xff]  ;;  %v46_v16 = vmul.f32 %v335_v11, %v335_v11  ;;  %v348_v17 = vld [vmem:[#allocation2 + $0x28] sm:$0xff] }
   0x9   :  { %v353_v18 = vld [vmem:[%s529_s1 + $0x28] sm:$0xff]  ;;  %v52_v19 = vadd.f32 %v44_v8, %v324_v7  ;;  %v47_v20 = vmul.f32 %v348_v17, %v348_v17  ;;  %v358_v21 = vld [vmem:[#allocation2 + $0x30] sm:$0xff]  ;;  %v360_v22 = vld [vmem:[#allocation2 + $0x38] sm:$0xff] }
   0xa   :  { %v58_v23 = vmul.f32 %v50_v12, %v301_v0  ;;  %v59_v24 = vmul.f32 %v51_v13, %v308_v2  ;;  %v53_v25 = vadd.f32 %v45_v14, %v333_v10  ;;  %v54_v26 = vadd.f32 %v46_v16, %v344_v15  ;;  %v369_v27 = vld [vmem:[%s529_s1 + $0x30] sm:$0xff]  ;;  %v374_v28 = vld [vmem:[%s529_s1 + $0x38] sm:$0xff]  ;;  %s282_s1 = smov [#allocation5]  }
   0xb   :  { %v60_v29 = vmul.f32 %v52_v19, %v319_v6  ;;  %v55_v30 = vadd.f32 %v47_v20, %v353_v18  ;;  %v48_v31 = vmul.f32 %v358_v21, %v358_v21  ;;  %v49_v32 = vmul.f32 %v360_v22, %v360_v22  ;;  %s215_s29 = sshll.u32 %s282_s1, 4  ;;  %s216_s29 = int_to_ptr.vmem [resolvable:$true] %s215_s29 }
   0xc   :  { %v66_v33 = vadd.f32 %v58_v23, %v306_v1  ;;  %v67_v34 = vadd.f32 %v59_v24, %v315_v4  ;;  %v61_v35 = vmul.f32 %v53_v25, %v328_v9  ;;  %v62_v36 = vmul.f32 %v54_v26, %v335_v11 }
   0xd   :  { %v68_v37 = vadd.f32 %v60_v29, %v324_v7  ;;  %v63_v38 = vmul.f32 %v55_v30, %v348_v17  ;;  %v56_v39 = vadd.f32 %v48_v31, %v369_v27  ;;  %v57_v40 = vadd.f32 %v49_v32, %v374_v28 }
   0xe   :  { %v74_v41 = vmul.f32 %v66_v33, %v301_v0  ;;  %v75_v42 = vmul.f32 %v67_v34, %v308_v2  ;;  %v69_v43 = vadd.f32 %v61_v35, %v333_v10  ;;  %v70_v44 = vadd.f32 %v62_v36, %v344_v15 }
   0xf   :  { %v76_v45 = vmul.f32 %v68_v37, %v319_v6  ;;  %v71_v46 = vadd.f32 %v63_v38, %v353_v18  ;;  %v64_v47 = vmul.f32 %v56_v39, %v358_v21  ;;  %v65_v48 = vmul.f32 %v57_v40, %v360_v22 }
  0x10   :  { %v82_v49 = vadd.f32 %v74_v41, %v306_v1  ;;  %v83_v50 = vadd.f32 %v75_v42, %v315_v4  ;;  %v77_v51 = vmul.f32 %v69_v43, %v328_v9  ;;  %v78_v52 = vmul.f32 %v70_v44, %v335_v11 }
  0x11   :  { %v84_v53 = vadd.f32 %v76_v45, %v324_v7  ;;  %v79_v54 = vmul.f32 %v71_v46, %v348_v17  ;;  %v72_v55 = vadd.f32 %v64_v47, %v369_v27  ;;  %v73_v56 = vadd.f32 %v65_v48, %v374_v28 }
  0x12   :  { %v90_v57 = vmul.f32 %v82_v49, %v301_v0  ;;  %v91_v58 = vmul.f32 %v83_v50, %v308_v2  ;;  %v85_v59 = vadd.f32 %v77_v51, %v333_v10  ;;  %v86_v60 = vadd.f32 %v78_v52, %v344_v15 }
  0x13   :  { %v92_v61 = vmul.f32 %v84_v53, %v319_v6  ;;  %v87_v62 = vadd.f32 %v79_v54, %v353_v18  ;;  %v80_v63 = vmul.f32 %v72_v55, %v358_v21  ;;  %v81_v3 = vmul.f32 %v73_v56, %v360_v22 }
  0x14   :  { %v98_v5 = vadd.f32 %v90_v57, %v306_v1  ;;  %v99_v8 = vadd.f32 %v91_v58, %v315_v4  ;;  %v93_v12 = vmul.f32 %v85_v59, %v328_v9  ;;  %v94_v13 = vmul.f32 %v86_v60, %v335_v11 }
  0x15   :  { %v100_v14 = vadd.f32 %v92_v61, %v324_v7  ;;  %v95_v16 = vmul.f32 %v87_v62, %v348_v17  ;;  %v88_v19 = vadd.f32 %v80_v63, %v369_v27  ;;  %v89_v20 = vadd.f32 %v81_v3, %v374_v28 }
  0x16   :  { %v106_v23 = vmul.f32 %v98_v5, %v301_v0  ;;  %v107_v24 = vmul.f32 %v99_v8, %v308_v2  ;;  %v101_v25 = vadd.f32 %v93_v12, %v333_v10  ;;  %v102_v26 = vadd.f32 %v94_v13, %v344_v15 }
  0x17   :  { %v108_v29 = vmul.f32 %v100_v14, %v319_v6  ;;  %v103_v30 = vadd.f32 %v95_v16, %v353_v18  ;;  %v96_v31 = vmul.f32 %v88_v19, %v358_v21  ;;  %v97_v32 = vmul.f32 %v89_v20, %v360_v22 }
  0x18   :  { %v114_v33 = vadd.f32 %v106_v23, %v306_v1  ;;  %v115_v34 = vadd.f32 %v107_v24, %v315_v4  ;;  %v109_v35 = vmul.f32 %v101_v25, %v328_v9  ;;  %v110_v36 = vmul.f32 %v102_v26, %v335_v11 }
  0x19   :  { %v116_v37 = vadd.f32 %v108_v29, %v324_v7  ;;  %v111_v38 = vmul.f32 %v103_v30, %v348_v17  ;;  %v104_v39 = vadd.f32 %v96_v31, %v369_v27  ;;  %v105_v40 = vadd.f32 %v97_v32, %v374_v28 }
  0x1a   :  { %v122_v41 = vmul.f32 %v114_v33, %v301_v0  ;;  %v123_v42 = vmul.f32 %v115_v34, %v308_v2  ;;  %v117_v43 = vadd.f32 %v109_v35, %v333_v10  ;;  %v118_v44 = vadd.f32 %v110_v36, %v344_v15 }
  0x1b   :  { %v124_v45 = vmul.f32 %v116_v37, %v319_v6  ;;  %v119_v46 = vadd.f32 %v111_v38, %v353_v18  ;;  %v112_v47 = vmul.f32 %v104_v39, %v358_v21  ;;  %v113_v48 = vmul.f32 %v105_v40, %v360_v22 }
  0x1c   :  { %v130_v49 = vadd.f32 %v122_v41, %v306_v1  ;;  %v131_v50 = vadd.f32 %v123_v42, %v315_v4  ;;  %v125_v51 = vmul.f32 %v117_v43, %v328_v9  ;;  %v126_v52 = vmul.f32 %v118_v44, %v335_v11 }
  0x1d   :  { %v132_v53 = vadd.f32 %v124_v45, %v324_v7  ;;  %v127_v54 = vmul.f32 %v119_v46, %v348_v17  ;;  %v120_v55 = vadd.f32 %v112_v47, %v369_v27  ;;  %v121_v56 = vadd.f32 %v113_v48, %v374_v28 }
  0x1e   :  { %v138_v57 = vmul.f32 %v130_v49, %v301_v0  ;;  %v139_v58 = vmul.f32 %v131_v50, %v308_v2  ;;  %v133_v59 = vadd.f32 %v125_v51, %v333_v10  ;;  %v134_v60 = vadd.f32 %v126_v52, %v344_v15 }
  0x1f   :  { %v140_v61 = vmul.f32 %v132_v53, %v319_v6  ;;  %v135_v62 = vadd.f32 %v127_v54, %v353_v18  ;;  %v128_v63 = vmul.f32 %v120_v55, %v358_v21  ;;  %v129_v3 = vmul.f32 %v121_v56, %v360_v22 }
  0x20   :  { %v146_v5 = vadd.f32 %v138_v57, %v306_v1  ;;  %v147_v8 = vadd.f32 %v139_v58, %v315_v4  ;;  %v141_v12 = vmul.f32 %v133_v59, %v328_v9  ;;  %v142_v13 = vmul.f32 %v134_v60, %v335_v11 }
  0x21   :  { %v148_v14 = vadd.f32 %v140_v61, %v324_v7  ;;  %v143_v16 = vmul.f32 %v135_v62, %v348_v17  ;;  %v136_v19 = vadd.f32 %v128_v63, %v369_v27  ;;  %v137_v20 = vadd.f32 %v129_v3, %v374_v28 }
  0x22   :  { %v154_v23 = vmul.f32 %v146_v5, %v301_v0  ;;  %v155_v24 = vmul.f32 %v147_v8, %v308_v2  ;;  %v149_v25 = vadd.f32 %v141_v12, %v333_v10  ;;  %v150_v26 = vadd.f32 %v142_v13, %v344_v15 }
  0x23   :  { %v156_v29 = vmul.f32 %v148_v14, %v319_v6  ;;  %v151_v30 = vadd.f32 %v143_v16, %v353_v18  ;;  %v144_v31 = vmul.f32 %v136_v19, %v358_v21  ;;  %v145_v32 = vmul.f32 %v137_v20, %v360_v22 }
  0x24   :  { %v162_v33 = vadd.f32 %v154_v23, %v306_v1  ;;  %v163_v34 = vadd.f32 %v155_v24, %v315_v4  ;;  %v157_v35 = vmul.f32 %v149_v25, %v328_v9  ;;  %v158_v36 = vmul.f32 %v150_v26, %v335_v11 }
  0x25   :  { %v164_v37 = vadd.f32 %v156_v29, %v324_v7  ;;  %v159_v38 = vmul.f32 %v151_v30, %v348_v17  ;;  %v152_v39 = vadd.f32 %v144_v31, %v369_v27  ;;  %v153_v40 = vadd.f32 %v145_v32, %v374_v28 }
  0x26   :  { %v170_v41 = vmul.f32 %v162_v33, %v301_v0  ;;  %v171_v42 = vmul.f32 %v163_v34, %v308_v2  ;;  %v165_v43 = vadd.f32 %v157_v35, %v333_v10  ;;  %v166_v44 = vadd.f32 %v158_v36, %v344_v15 }
  0x27   :  { %v172_v45 = vmul.f32 %v164_v37, %v319_v6  ;;  %v167_v46 = vadd.f32 %v159_v38, %v353_v18  ;;  %v160_v47 = vmul.f32 %v152_v39, %v358_v21  ;;  %v161_v48 = vmul.f32 %v153_v40, %v360_v22 }
  0x28   :  { %v178_v49 = vadd.f32 %v170_v41, %v306_v1  ;;  %v179_v50 = vadd.f32 %v171_v42, %v315_v4  ;;  %v173_v51 = vmul.f32 %v165_v43, %v328_v9  ;;  %v174_v52 = vmul.f32 %v166_v44, %v335_v11 }
  0x29   :  { %v180_v53 = vadd.f32 %v172_v45, %v324_v7  ;;  %v175_v54 = vmul.f32 %v167_v46, %v348_v17  ;;  %v168_v55 = vadd.f32 %v160_v47, %v369_v27  ;;  %v169_v56 = vadd.f32 %v161_v48, %v374_v28 }
  0x2a   :  { %v186_v57 = vmul.f32 %v178_v49, %v301_v0  ;;  %v187_v58 = vmul.f32 %v179_v50, %v308_v2  ;;  %v181_v59 = vadd.f32 %v173_v51, %v333_v10  ;;  %v182_v60 = vadd.f32 %v174_v52, %v344_v15 }
  0x2b   :  { %v188_v61 = vmul.f32 %v180_v53, %v319_v6  ;;  %v183_v62 = vadd.f32 %v175_v54, %v353_v18  ;;  %v176_v63 = vmul.f32 %v168_v55, %v358_v21  ;;  %v177_v3 = vmul.f32 %v169_v56, %v360_v22 }
  0x2c   :  { %v194_v5 = vadd.f32 %v186_v57, %v306_v1  ;;  %v195_v8 = vadd.f32 %v187_v58, %v315_v4  ;;  %v189_v0 = vmul.f32 %v181_v59, %v328_v9  ;;  %v190_v2 = vmul.f32 %v182_v60, %v335_v11 }
  0x2d   :  { %v196_v12 = vadd.f32 %v188_v61, %v324_v7  ;;  %v191_v13 = vmul.f32 %v183_v62, %v348_v17  ;;  %v184_v6 = vadd.f32 %v176_v63, %v369_v27  ;;  %v185_v14 = vadd.f32 %v177_v3, %v374_v28 }
  0x2e   :  { %202 = vst [vmem:[#allocation5] sm:$0xff] %v194_v5  ;;  %v197_v16 = vadd.f32 %v189_v0, %v333_v10  ;;  %v198_v19 = vadd.f32 %v190_v2, %v344_v15 }
  0x2f   :  { %203 = vst [vmem:[#allocation5 + $0x8] sm:$0xff] %v195_v8  ;;  %v199_v1 = vadd.f32 %v191_v13, %v353_v18  ;;  %v192_v4 = vmul.f32 %v184_v6, %v358_v21  ;;  %v193_v9 = vmul.f32 %v185_v14, %v360_v22 }
  0x30   :  { %204 = vst [vmem:[#allocation5 + $0x10] sm:$0xff] %v196_v12 }
  0x31   :  { %205 = vst [vmem:[#allocation5 + $0x18] sm:$0xff] %v197_v16  ;;  %v200_v7 = vadd.f32 %v192_v4, %v369_v27  ;;  %v201_v10 = vadd.f32 %v193_v9, %v374_v28 }
  0x32   :  { %206 = vst [vmem:[#allocation5 + $0x20] sm:$0xff] %v198_v19 }
  0x33   :  { %207 = vst [vmem:[#allocation5 + $0x28] sm:$0xff] %v199_v1 }
  0x34   :  { %208 = vst [vmem:[#allocation5 + $0x30] sm:$0xff] %v200_v7 }
  0x35   :  { %209 = vst [vmem:[#allocation5 + $0x38] sm:$0xff] %v201_v10 }
  0x36   :  { %220 = dma.vmem_to_hbm [thread:$0]  %s216_s29, 1024, %s218_s4, [#allocation4]  }
  0x37   :  { %279 = dma.done.wait [#allocation4], 1024  }
  0x38   :  { %280 = vsyncadd [#allocation4], 4294966272 }
  0x39   :  { %225 = vsyncpa [#allocation3], 1 }
  0x3a   :  { %226 = vsyncpa [#allocation4], 1 }

</bundles_post_ra>
